<compile_context>
chip_gen: v7x
topology: tpu7x:2x2x1
jax: 0.10.0
libtpu: 0.0.40
codegen_flags: <defaults>
</compile_context>

<pallas_src>
import jax
import jax.numpy as jnp
from jax.experimental import pallas as pl
from jax.experimental.pallas import tpu as pltpu

BN_EPS = 1e-5
LANE = 128


def _round_up(v, m):
    return (v + m - 1) // m * m


# ----------------------------------------------------------------------------
# Fused kernel: all GIN layers + BatchNorm + global add pool in one pallas_call
# ----------------------------------------------------------------------------
def fused_gin_encoder(a_hat, x0, w1, b1, w2, b2, gamma, beta, pool_mat,
                      *, n_nodes, tm, a_resident, vmem_limit_bytes):
    n_pad = a_hat.shape[0]
    num_layers, d_pad, _ = w1.shape
    g = pool_mat.shape[0]
    nt = n_pad // tm

    def kernel(a_ref, x0_ref, w1_ref, b1_ref, w2_ref, b2_ref, gam_ref, bet_ref,
               pm_ref, xs_ref, xpool_ref, x_buf, z_buf, s_ref, ss_ref,
               copy_sem):
        lyr = pl.program_id(0)
        ph = pl.program_id(1)     # 0 = aggregate/MLP/stats, 1 = normalize/pool
        rt = pl.program_id(2)     # node-row tile
        row0 = pl.multiple_of(rt * tm, tm)

        # One-shot DMA of the layer-0 input activations (bf16) into the
        # resident activation buffer; x0 stays in HBM otherwise.
        @pl.when((lyr == 0) & (ph == 0) & (rt == 0))
        def _():
            cp = pltpu.make_async_copy(x0_ref, x_buf, copy_sem.at[0])
            cp.start()
            cp.wait()

        # -------- pass 0: GIN aggregate -> MLP -> ReLU, partial BN stats -----
        @pl.when(ph == 0)
        def _():
            @pl.when(rt == 0)
            def _():
                s_ref[...] = jnp.zeros_like(s_ref)
                ss_ref[...] = jnp.zeros_like(ss_ref)

            if a_resident:
                a = a_ref[pl.ds(row0, tm), :]                 # (tm, n_pad) bf16
            else:
                a = a_ref[...]                                # (tm, n_pad) bf16
            x_src = x_buf[...]                                # (n_pad, d_pad) bf16
            # (1+eps)*x_i + sum_j x_j  with eps = 0   ==   A_hat @ x
            h = jnp.dot(a, x_src, preferred_element_type=jnp.float32)
            h1 = jnp.dot(h.astype(jnp.bfloat16), w1_ref[0],
                         preferred_element_type=jnp.float32) + b1_ref[0]
            h1 = jnp.maximum(h1, 0.0)
            h2 = jnp.dot(h1.astype(jnp.bfloat16), w2_ref[0],
                         preferred_element_type=jnp.float32) + b2_ref[0]
            z = jnp.maximum(h2, 0.0)                          # outer F.relu
            # mask pure-padding rows so BN statistics stay exact
            rows = jax.lax.broadcasted_iota(jnp.int32, (tm, 1), 0) + row0
            z = jnp.where(rows < n_nodes, z, 0.0)
            z_buf[pl.ds(row0, tm), :] = z
            s_ref[...] += jnp.sum(z, axis=0, keepdims=True)
            ss_ref[...] += jnp.sum(z * z, axis=0, keepdims=True)

        # -------- pass 1: BatchNorm, emit xs, feed next layer, pool ----------
        @pl.when(ph == 1)
        def _():
            mean = s_ref[...] * (1.0 / n_nodes)
            var = jnp.maximum(ss_ref[...] * (1.0 / n_nodes) - mean * mean, 0.0)
            inv_std = jax.lax.rsqrt(var + BN_EPS)
            z = z_buf[pl.ds(row0, tm), :]
            y = gam_ref[0] * (z - mean) * inv_std + bet_ref[0]
            xs_ref[...] = y
            # Padded rows of y are nonzero (beta - gamma*mean*inv_std) but are
            # harmless: A_hat / pool_mat columns for padded nodes are zero and
            # xs is sliced to n_nodes by the host wrapper.
            x_buf[pl.ds(row0, tm), :] = y.astype(jnp.bfloat16)

            @pl.when(rt == 0)
            def _():
                xpool_ref[...] = jnp.zeros_like(xpool_ref)
            # fused global-add-pool readout: P[:, tile] @ y
            xpool_ref[...] += jnp.dot(pm_ref[...], y,
                                      preferred_element_type=jnp.float32)

    layer_map = lambda l, q, r: (l, 0, 0)
    if a_resident:
        # A_hat sits in VMEM for the whole kernel: one HBM stream total.
        a_spec = pl.BlockSpec((n_pad, n_pad), lambda l, q, r: (0, 0))
    else:
        # Stream row tiles during pass 0; pin to the last tile in pass 1 so
        # A_hat is fetched exactly once per layer.
        a_spec = pl.BlockSpec(
            (tm, n_pad), lambda l, q, r: (jnp.where(q == 0, r, nt - 1), 0))

    return pl.pallas_call(
        kernel,
        out_shape=(
            jax.ShapeDtypeStruct((n_pad, num_layers * d_pad), jnp.float32),
            jax.ShapeDtypeStruct((g, num_layers * d_pad), jnp.float32),
        ),
        grid_spec=pltpu.PrefetchScalarGridSpec(
            num_scalar_prefetch=0,
            grid=(num_layers, 2, nt),
            in_specs=[
                a_spec,                                          # A_hat (bf16)
                pl.BlockSpec(memory_space=pl.ANY),               # x0 (HBM, bf16)
                pl.BlockSpec((1, d_pad, d_pad), layer_map),      # W1 (bf16)
                pl.BlockSpec((1, 1, d_pad), layer_map),          # b1
                pl.BlockSpec((1, d_pad, d_pad), layer_map),      # W2 (bf16)
                pl.BlockSpec((1, 1, d_pad), layer_map),          # b2
                pl.BlockSpec((1, 1, d_pad), layer_map),          # gamma
                pl.BlockSpec((1, 1, d_pad), layer_map),          # beta
                # pool matrix block only advances during pass 1
                pl.BlockSpec((g, tm),
                             lambda l, q, r: (0, jnp.where(q == 1, r, 0))),
            ],
            out_specs=[
                pl.BlockSpec((tm, d_pad),
                             lambda l, q, r: (jnp.where(q == 1, r, 0), l)),
                pl.BlockSpec((g, d_pad), lambda l, q, r: (0, l)),
            ],
            scratch_shapes=[
                pltpu.VMEM((n_pad, d_pad), jnp.bfloat16),        # activations
                pltpu.VMEM((n_pad, d_pad), jnp.float32),         # pre-BN z
                pltpu.VMEM((1, d_pad), jnp.float32),             # BN sum
                pltpu.VMEM((1, d_pad), jnp.float32),             # BN sum of sq
                pltpu.SemaphoreType.DMA((1,)),                   # x0 init DMA
            ]),
        compiler_params=pltpu.CompilerParams(
            dimension_semantics=("arbitrary", "arbitrary", "arbitrary"),
            vmem_limit_bytes=int(vmem_limit_bytes)),
    )(a_hat, x0, w1, b1, w2, b2, gamma, beta, pool_mat)


# ----------------------------------------------------------------------------
# Encoder forward (glue in plain JAX, hot path in the fused Pallas kernel)
# ----------------------------------------------------------------------------
def encoder_forward(x, edge_index, batch, params, num_graphs):
    n_nodes, num_features = x.shape
    num_layers = len(params)
    dim = params[0]["w2"].shape[1]
    d_pad = _round_up(max(num_features, dim), LANE)
    tm = _round_up(n_nodes, 8) if n_nodes <= 512 else 512
    n_pad = _round_up(n_nodes, tm)
    g = num_graphs

    # Shape-derived VMEM budgeting (physical capacity when queryable).
    try:
        phys_vmem = int(pltpu.get_tpu_info().vmem_capacity_bytes)
    except Exception:
        phys_vmem = 64 * 1024 * 1024          # conservative fallback (v7x-safe)

    def _vmem_need(resident):
        a_bytes = n_pad * n_pad * 2 if resident else 2 * tm * n_pad * 2
        scratch = n_pad * d_pad * 2 + n_pad * d_pad * 4 + 2 * d_pad * 4
        weights = 2 * (2 * d_pad * d_pad * 2 + 4 * d_pad * 4)   # double-buffered
        pool = 2 * g * tm * 4
        outs = 2 * (tm * d_pad * 4 + g * d_pad * 4)
        return a_bytes + scratch + weights + pool + outs

    budget = int(phys_vmem * 0.75)
    a_resident = _vmem_need(True) <= budget
    need = _vmem_need(a_resident)
    vmem_limit = min(max(need + (8 << 20), 32 << 20), phys_vmem - (8 << 20))

    # Dense GIN operator A_hat = A + I  (A[i, j] = # edges j -> i), built
    # directly in bf16 (small integer edge counts are exact in bf16).
    src, dst = edge_index[0], edge_index[1]
    idx = jnp.arange(n_nodes)
    a_hat = (jnp.zeros((n_pad, n_pad), jnp.bfloat16)
             .at[dst, src].add(jnp.bfloat16(1.0))
             .at[idx, idx].add(jnp.bfloat16(1.0)))

    # Pooling matrix  P[g, n] = 1  iff  batch[n] == g  (global add pool).
    pool_mat = jnp.zeros((num_graphs, n_pad), jnp.float32)
    pool_mat = pool_mat.at[batch, jnp.arange(n_nodes)].set(1.0)

    x0 = jnp.pad(x.astype(jnp.bfloat16),
                 ((0, n_pad - n_nodes), (0, d_pad - num_features)))

    def pad2(a):
        return jnp.pad(a, ((0, d_pad - a.shape[0]), (0, d_pad - a.shape[1])))

    def pad_row(a):
        return jnp.pad(a, ((0, 0), (0, d_pad - a.shape[1])))

    w1 = jnp.stack([pad2(p["w1"]).astype(jnp.bfloat16) for p in params])
    b1 = jnp.stack([pad_row(p["b1"]) for p in params])
    w2 = jnp.stack([pad2(p["w2"]).astype(jnp.bfloat16) for p in params])
    b2 = jnp.stack([pad_row(p["b2"]) for p in params])
    gamma = jnp.stack([pad_row(p["gamma"]) for p in params])  # 0-padded cols
    beta = jnp.stack([pad_row(p["beta"]) for p in params])

    xs_pad, xpool_pad = fused_gin_encoder(
        a_hat, x0, w1, b1, w2, b2, gamma, beta, pool_mat,
        n_nodes=n_nodes, tm=tm, a_resident=a_resident,
        vmem_limit_bytes=vmem_limit)

    xs_cat = jnp.concatenate(
        [xs_pad[:n_nodes, l * d_pad:l * d_pad + dim] for l in range(num_layers)],
        axis=1)
    xpool = jnp.concatenate(
        [xpool_pad[:, l * d_pad:l * d_pad + dim] for l in range(num_layers)],
        axis=1)
    return xpool, xs_cat


# ----------------------------------------------------------------------------
# Pure-JAX reference with matching numerics (bf16 aggregation + bf16 MLP)
# ----------------------------------------------------------------------------
def encoder_reference(x, edge_index, batch, params, num_graphs):
    n = x.shape[0]
    src, dst = edge_index[0], edge_index[1]
    idx = jnp.arange(n)
    a_hat = (jnp.zeros((n, n), jnp.bfloat16)
             .at[dst, src].add(jnp.bfloat16(1.0))
             .at[idx, idx].add(jnp.bfloat16(1.0)))
    pool = jnp.zeros((num_graphs, n), jnp.float32)
    pool = pool.at[batch, jnp.arange(n)].set(1.0)
    h = x.astype(jnp.float32)
    xs = []
    for p in params:
        agg = jnp.dot(a_hat, h.astype(jnp.bfloat16),
                      preferred_element_type=jnp.float32)
        h1 = jnp.maximum(
            jnp.dot(agg.astype(jnp.bfloat16), p["w1"].astype(jnp.bfloat16),
                    preferred_element_type=jnp.float32) + p["b1"], 0.0)
        z = jnp.maximum(
            jnp.dot(h1.astype(jnp.bfloat16), p["w2"].astype(jnp.bfloat16),
                    preferred_element_type=jnp.float32) + p["b2"], 0.0)
        mean = jnp.mean(z, axis=0, keepdims=True)
        var = jnp.maximum(jnp.mean(z * z, axis=0, keepdims=True) - mean * mean,
                          0.0)
        h = p["gamma"] * (z - mean) * jax.lax.rsqrt(var + BN_EPS) + p["beta"]
        xs.append(h)
    xs_cat = jnp.concatenate(xs, axis=1)
    return pool @ xs_cat, xs_cat


def init_params(key, num_features, dim, num_gc_layers):
    params = []
    for i in range(num_gc_layers):
        d_in = num_features if i == 0 else dim
        key, k1, k2, k3, k4 = jax.random.split(key, 5)
        params.append(dict(
            w1=(jax.random.normal(k1, (d_in, dim), jnp.float32)
                * (1.0 / jnp.sqrt(d_in))),
            b1=jax.random.normal(k2, (1, dim), jnp.float32) * 0.01,
            w2=(jax.random.normal(k3, (dim, dim), jnp.float32)
                * (1.0 / jnp.sqrt(dim))),
            b2=jax.random.normal(k4, (1, dim), jnp.float32) * 0.01,
            gamma=jnp.ones((1, dim), jnp.float32),    # BatchNorm1d default
            beta=jnp.zeros((1, dim), jnp.float32),    # BatchNorm1d default
        ))
    return params


if __name__ == "__main__":
    # Small deterministic graph batch: 32 nodes, 8 features, dim=32,
    # 3 GIN layers, 4 graphs (8 nodes each), ring + skip edges per graph.
    NUM_NODES, NUM_FEATURES, DIM, NUM_LAYERS, NUM_GRAPHS = 32, 8, 32, 3, 4

    key = jax.random.PRNGKey(0)
    key, kx = jax.random.split(key)
    x = jax.random.normal(kx, (NUM_NODES, NUM_FEATURES), jnp.float32)

    nodes_per_graph = NUM_NODES // NUM_GRAPHS
    batch = jnp.repeat(jnp.arange(NUM_GRAPHS, dtype=jnp.int32), nodes_per_graph)

    # Deterministic edges: per-graph directed ring in both directions + a skip.
    srcs, dsts = [], []
    for gph in range(NUM_GRAPHS):
        base = gph * nodes_per_graph
        for k in range(nodes_per_graph):
            a = base + k
            b = base + (k + 1) % nodes_per_graph
            c = base + (k + 3) % nodes_per_graph
            srcs += [a, b, a]
            dsts += [b, a, c]
    edge_index = jnp.stack([jnp.array(srcs, jnp.int32),
                            jnp.array(dsts, jnp.int32)], axis=0)

    params = init_params(key, NUM_FEATURES, DIM, NUM_LAYERS)

    xpool, xs_cat = jax.jit(
        lambda x_, ei_, b_: encoder_forward(x_, ei_, b_, params, NUM_GRAPHS)
    )(x, edge_index, batch)
    jax.block_until_ready((xpool, xs_cat))

    assert xpool.shape == (NUM_GRAPHS, NUM_LAYERS * DIM)
    assert xs_cat.shape == (NUM_NODES, NUM_LAYERS * DIM)
    assert bool(jnp.all(jnp.isfinite(xpool))) and bool(jnp.all(jnp.isfinite(xs_cat)))

    # Correctness check against a pure-JAX reference with matching precision.
    xpool_ref, xs_ref = jax.jit(
        lambda x_, ei_, b_: encoder_reference(x_, ei_, b_, params, NUM_GRAPHS)
    )(x, edge_index, batch)
    assert jnp.allclose(xs_cat, xs_ref, rtol=1e-2, atol=1e-2)
    assert jnp.allclose(xpool, xpool_ref, rtol=1e-2, atol=1e-2)

    print("KERNEL_OK")
</pallas_src>

<mosaic_0001>
module attributes {stable_mosaic.version = 11 : i64} {
  func.func @kernel(%arg0: i32, %arg1: i32, %arg2: i32, %arg3: memref<32x32xbf16, #tpu.memory_space<vmem>>, %arg4: memref<32x128xbf16, #tpu.memory_space<any>>, %arg5: memref<1x128x128xbf16, #tpu.memory_space<vmem>>, %arg6: memref<1x1x128xf32, #tpu.memory_space<vmem>>, %arg7: memref<1x128x128xbf16, #tpu.memory_space<vmem>>, %arg8: memref<1x1x128xf32, #tpu.memory_space<vmem>>, %arg9: memref<1x1x128xf32, #tpu.memory_space<vmem>>, %arg10: memref<1x1x128xf32, #tpu.memory_space<vmem>>, %arg11: memref<4x32xf32, #tpu.memory_space<vmem>>, %arg12: memref<32x128xf32, #tpu.memory_space<vmem>>, %arg13: memref<4x128xf32, #tpu.memory_space<vmem>>, %arg14: memref<32x128xbf16, #tpu.memory_space<vmem>>, %arg15: memref<32x128xf32, #tpu.memory_space<vmem>>, %arg16: memref<1x128xf32, #tpu.memory_space<vmem>>, %arg17: memref<1x128xf32, #tpu.memory_space<vmem>>, %arg18: memref<1x!tpu.dma_semaphore, #tpu.memory_space<semaphore_mem>>) attributes {dimension_semantics = [#tpu.dimension_semantics<arbitrary>, #tpu.dimension_semantics<arbitrary>, #tpu.dimension_semantics<arbitrary>], iteration_bounds = array<i64: 3, 2, 1>, scalar_prefetch = 0 : i64, scratch_operands = 5 : i64, tpu.core_type = #tpu.core_type<tc>, window_params = [{pipeline_mode = #tpu.pipeline_mode<synchronous>, transform_indices = @transform_0, window_bounds = array<i64: 32, 32>}, {}, {transform_indices = @transform_2, window_bounds = array<i64: 1, 128, 128>}, {transform_indices = @transform_3, window_bounds = array<i64: 1, 1, 128>}, {transform_indices = @transform_4, window_bounds = array<i64: 1, 128, 128>}, {transform_indices = @transform_5, window_bounds = array<i64: 1, 1, 128>}, {transform_indices = @transform_6, window_bounds = array<i64: 1, 1, 128>}, {transform_indices = @transform_7, window_bounds = array<i64: 1, 1, 128>}, {transform_indices = @transform_8, window_bounds = array<i64: 4, 32>}, {transform_indices = @transform_9, window_bounds = array<i64: 32, 128>}, {transform_indices = @transform_10, window_bounds = array<i64: 4, 128>}]} {
    %c32_i32 = arith.constant 32 : i32
    %0 = arith.muli %arg2, %c32_i32 : i32
    %1 = tpu.assume_multiple %0, 32 : i32
    %c0_i32 = arith.constant 0 : i32
    %2 = arith.cmpi eq, %arg0, %c0_i32 : i32
    %c0_i32_0 = arith.constant 0 : i32
    %3 = arith.cmpi eq, %arg1, %c0_i32_0 : i32
    %4 = arith.andi %2, %3 : i1
    %c0_i32_1 = arith.constant 0 : i32
    %5 = arith.cmpi eq, %arg2, %c0_i32_1 : i32
    %6 = arith.andi %4, %5 : i1
    %7 = arith.extui %6 : i1 to i32
    %c0_i32_2 = arith.constant 0 : i32
    %8 = arith.cmpi ne, %7, %c0_i32_2 : i32
    scf.if %8 {
      %c0_i32_6 = arith.constant 0 : i32
      %15 = tpu.memref_slice %arg18[%c0_i32_6] : memref<1x!tpu.dma_semaphore, #tpu.memory_space<semaphore_mem>> -> memref<1x!tpu.dma_semaphore, #tpu.memory_space<semaphore_mem>>
      %16 = tpu.memref_squeeze %15 : memref<1x!tpu.dma_semaphore, #tpu.memory_space<semaphore_mem>> -> memref<!tpu.dma_semaphore, #tpu.memory_space<semaphore_mem>>
      tpu.enqueue_dma source(%arg4 : memref<32x128xbf16, #tpu.memory_space<any>>) target(%arg14 : memref<32x128xbf16, #tpu.memory_space<vmem>>) target_semaphore(%16 : memref<!tpu.dma_semaphore, #tpu.memory_space<semaphore_mem>>)
      %c0_i32_7 = arith.constant 0 : i32
      %17 = tpu.memref_slice %arg18[%c0_i32_7] : memref<1x!tpu.dma_semaphore, #tpu.memory_space<semaphore_mem>> -> memref<1x!tpu.dma_semaphore, #tpu.memory_space<semaphore_mem>>
      %18 = tpu.memref_squeeze %17 : memref<1x!tpu.dma_semaphore, #tpu.memory_space<semaphore_mem>> -> memref<!tpu.dma_semaphore, #tpu.memory_space<semaphore_mem>>
      tpu.wait_dma2 semaphore(%18 : memref<!tpu.dma_semaphore, #tpu.memory_space<semaphore_mem>>) src(%arg4 : memref<32x128xbf16, #tpu.memory_space<any>>) dst(%arg14 : memref<32x128xbf16, #tpu.memory_space<vmem>>)
    } else {
    }
    %c0_i32_3 = arith.constant 0 : i32
    %9 = arith.cmpi eq, %arg1, %c0_i32_3 : i32
    %10 = arith.extui %9 : i1 to i32
    %c0_i32_4 = arith.constant 0 : i32
    %11 = arith.cmpi ne, %10, %c0_i32_4 : i32
    scf.if %11 {
      %c0_i32_6 = arith.constant 0 : i32
      %15 = arith.cmpi eq, %arg2, %c0_i32_6 : i32
      %16 = arith.extui %15 : i1 to i32
      %c0_i32_7 = arith.constant 0 : i32
      %17 = arith.cmpi ne, %16, %c0_i32_7 : i32
      scf.if %17 {
        %cst_39 = arith.constant 0.000000e+00 : f32
        %64 = vector.broadcast %cst_39 : f32 to vector<1x128xf32>
        %c0_40 = arith.constant 0 : index
        %c0_41 = arith.constant 0 : index
        %65 = vector.load %arg16[%c0_40, %c0_41] : memref<1x128xf32, #tpu.memory_space<vmem>>, vector<1x128xf32>
        tpu.vector_store %arg16[%c0_40, %c0_41], %64 {strides = array<i32>} : memref<1x128xf32, #tpu.memory_space<vmem>>, vector<1x128xf32>,
        %cst_42 = arith.constant 0.000000e+00 : f32
        %66 = vector.broadcast %cst_42 : f32 to vector<1x128xf32>
        %c0_43 = arith.constant 0 : index
        %c0_44 = arith.constant 0 : index
        %67 = vector.load %arg17[%c0_43, %c0_44] : memref<1x128xf32, #tpu.memory_space<vmem>>, vector<1x128xf32>
        tpu.vector_store %arg17[%c0_43, %c0_44], %66 {strides = array<i32>} : memref<1x128xf32, #tpu.memory_space<vmem>>, vector<1x128xf32>,
      } else {
      }
      %18 = arith.index_cast %1 : i32 to index
      %c0 = arith.constant 0 : index
      %19 = vector.load %arg3[%18, %c0] : memref<32x32xbf16, #tpu.memory_space<vmem>>, vector<32x32xbf16>
      %c0_8 = arith.constant 0 : index
      %c0_9 = arith.constant 0 : index
      %20 = vector.load %arg14[%c0_8, %c0_9] : memref<32x128xbf16, #tpu.memory_space<vmem>>, vector<32x128xbf16>
      %cst = arith.constant dense<0.000000e+00> : vector<32x128xf32>
      %21 = tpu.matmul %19, %20, %cst {dimension_numbers = #tpu.dot_dimension_numbers<[1], [0], [0], [1], [0, 0, 1, 1], [], []>} : vector<32x32xbf16>, vector<32x128xbf16>, vector<32x128xf32> -> vector<32x128xf32>
      %22 = arith.truncf %21 : vector<32x128xf32> to vector<32x128xbf16>
      %c0_10 = arith.constant 0 : index
      %c0_11 = arith.constant 0 : index
      %c0_12 = arith.constant 0 : index
      %23 = vector.load %arg5[%c0_10, %c0_11, %c0_12] : memref<1x128x128xbf16, #tpu.memory_space<vmem>>, vector<1x128x128xbf16>
      %24 = vector.shape_cast %23 : vector<1x128x128xbf16> to vector<128x128xbf16>
      %cst_13 = arith.constant dense<0.000000e+00> : vector<32x128xf32>
      %25 = tpu.matmul %22, %24, %cst_13 {dimension_numbers = #tpu.dot_dimension_numbers<[1], [0], [0], [1], [0, 0, 1, 1], [], []>} : vector<32x128xbf16>, vector<128x128xbf16>, vector<32x128xf32> -> vector<32x128xf32>
      %c0_14 = arith.constant 0 : index
      %c0_15 = arith.constant 0 : index
      %c0_16 = arith.constant 0 : index
      %26 = vector.load %arg6[%c0_14, %c0_15, %c0_16] : memref<1x1x128xf32, #tpu.memory_space<vmem>>, vector<1x1x128xf32>
      %27 = vector.shape_cast %26 : vector<1x1x128xf32> to vector<1x128xf32>
      %28 = vector.broadcast %27 : vector<1x128xf32> to vector<32x128xf32>
      %29 = arith.addf %25, %28 : vector<32x128xf32>
      %cst_17 = arith.constant 0.000000e+00 : f32
      %30 = vector.broadcast %cst_17 : f32 to vector<32x128xf32>
      %31 = arith.maximumf %29, %30 : vector<32x128xf32>
      %32 = arith.truncf %31 : vector<32x128xf32> to vector<32x128xbf16>
      %c0_18 = arith.constant 0 : index
      %c0_19 = arith.constant 0 : index
      %c0_20 = arith.constant 0 : index
      %33 = vector.load %arg7[%c0_18, %c0_19, %c0_20] : memref<1x128x128xbf16, #tpu.memory_space<vmem>>, vector<1x128x128xbf16>
      %34 = vector.shape_cast %33 : vector<1x128x128xbf16> to vector<128x128xbf16>
      %cst_21 = arith.constant dense<0.000000e+00> : vector<32x128xf32>
      %35 = tpu.matmul %32, %34, %cst_21 {dimension_numbers = #tpu.dot_dimension_numbers<[1], [0], [0], [1], [0, 0, 1, 1], [], []>} : vector<32x128xbf16>, vector<128x128xbf16>, vector<32x128xf32> -> vector<32x128xf32>
      %c0_22 = arith.constant 0 : index
      %c0_23 = arith.constant 0 : index
      %c0_24 = arith.constant 0 : index
      %36 = vector.load %arg8[%c0_22, %c0_23, %c0_24] : memref<1x1x128xf32, #tpu.memory_space<vmem>>, vector<1x1x128xf32>
      %37 = vector.shape_cast %36 : vector<1x1x128xf32> to vector<1x128xf32>
      %38 = vector.broadcast %37 : vector<1x128xf32> to vector<32x128xf32>
      %39 = arith.addf %35, %38 : vector<32x128xf32>
      %cst_25 = arith.constant 0.000000e+00 : f32
      %40 = vector.broadcast %cst_25 : f32 to vector<32x128xf32>
      %41 = arith.maximumf %39, %40 : vector<32x128xf32>
      %42 = tpu.iota {dimensions = array<i32: 0>} : vector<32x1xi32>
      %43 = vector.broadcast %1 : i32 to vector<32x1xi32>
      %44 = arith.addi %42, %43 : vector<32x1xi32>
      %c32_i32_26 = arith.constant 32 : i32
      %45 = vector.broadcast %c32_i32_26 : i32 to vector<32x1xi32>
      %46 = arith.cmpi slt, %44, %45 : vector<32x1xi32>
      %cst_27 = arith.constant 0.000000e+00 : f32
      %47 = vector.shape_cast %46 : vector<32x1xi1> to vector<32x1xi1>
      %48 = vector.broadcast %47 : vector<32x1xi1> to vector<32x128xi1>
      %49 = vector.broadcast %cst_27 : f32 to vector<32x128xf32>
      %50 = arith.select %48, %41, %49 : vector<32x128xi1>, vector<32x128xf32>
      %51 = arith.index_cast %1 : i32 to index
      %c0_28 = arith.constant 0 : index
      %52 = vector.load %arg15[%51, %c0_28] : memref<32x128xf32, #tpu.memory_space<vmem>>, vector<32x128xf32>
      tpu.vector_store %arg15[%51, %c0_28], %50 {strides = array<i32>} : memref<32x128xf32, #tpu.memory_space<vmem>>, vector<32x128xf32>,
      %c0_29 = arith.constant 0 : index
      %c0_30 = arith.constant 0 : index
      %53 = vector.load %arg16[%c0_29, %c0_30] : memref<1x128xf32, #tpu.memory_space<vmem>>, vector<1x128xf32>
      %cst_31 = arith.constant dense<0.000000e+00> : vector<128xf32>
      %54 = vector.multi_reduction <add>, %50, %cst_31 [0] : vector<32x128xf32> to vector<128xf32>
      %55 = vector.shape_cast %54 : vector<128xf32> to vector<1x128xf32>
      %56 = arith.addf %53, %55 : vector<1x128xf32>
      %c0_32 = arith.constant 0 : index
      %c0_33 = arith.constant 0 : index
      %57 = vector.load %arg16[%c0_32, %c0_33] : memref<1x128xf32, #tpu.memory_space<vmem>>, vector<1x128xf32>
      tpu.vector_store %arg16[%c0_32, %c0_33], %56 {strides = array<i32>} : memref<1x128xf32, #tpu.memory_space<vmem>>, vector<1x128xf32>,
      %c0_34 = arith.constant 0 : index
      %c0_35 = arith.constant 0 : index
      %58 = vector.load %arg17[%c0_34, %c0_35] : memref<1x128xf32, #tpu.memory_space<vmem>>, vector<1x128xf32>
      %59 = arith.mulf %50, %50 : vector<32x128xf32>
      %cst_36 = arith.constant dense<0.000000e+00> : vector<128xf32>
      %60 = vector.multi_reduction <add>, %59, %cst_36 [0] : vector<32x128xf32> to vector<128xf32>
      %61 = vector.shape_cast %60 : vector<128xf32> to vector<1x128xf32>
      %62 = arith.addf %58, %61 : vector<1x128xf32>
      %c0_37 = arith.constant 0 : index
      %c0_38 = arith.constant 0 : index
      %63 = vector.load %arg17[%c0_37, %c0_38] : memref<1x128xf32, #tpu.memory_space<vmem>>, vector<1x128xf32>
      tpu.vector_store %arg17[%c0_37, %c0_38], %62 {strides = array<i32>} : memref<1x128xf32, #tpu.memory_space<vmem>>, vector<1x128xf32>,
    } else {
    }
    %c1_i32 = arith.constant 1 : i32
    %12 = arith.cmpi eq, %arg1, %c1_i32 : i32
    %13 = arith.extui %12 : i1 to i32
    %c0_i32_5 = arith.constant 0 : i32
    %14 = arith.cmpi ne, %13, %c0_i32_5 : i32
    scf.if %14 {
      %c0 = arith.constant 0 : index
      %c0_6 = arith.constant 0 : index
      %15 = vector.load %arg16[%c0, %c0_6] : memref<1x128xf32, #tpu.memory_space<vmem>>, vector<1x128xf32>
      %cst = arith.constant 3.125000e-02 : f32
      %16 = vector.broadcast %cst : f32 to vector<1x128xf32>
      %17 = arith.mulf %15, %16 : vector<1x128xf32>
      %c0_7 = arith.constant 0 : index
      %c0_8 = arith.constant 0 : index
      %18 = vector.load %arg17[%c0_7, %c0_8] : memref<1x128xf32, #tpu.memory_space<vmem>>, vector<1x128xf32>
      %cst_9 = arith.constant 3.125000e-02 : f32
      %19 = vector.broadcast %cst_9 : f32 to vector<1x128xf32>
      %20 = arith.mulf %18, %19 : vector<1x128xf32>
      %21 = arith.mulf %17, %17 : vector<1x128xf32>
      %22 = arith.subf %20, %21 : vector<1x128xf32>
      %cst_10 = arith.constant 0.000000e+00 : f32
      %23 = vector.broadcast %cst_10 : f32 to vector<1x128xf32>
      %24 = arith.maximumf %22, %23 : vector<1x128xf32>
      %cst_11 = arith.constant 9.99999974E-6 : f32
      %25 = vector.broadcast %cst_11 : f32 to vector<1x128xf32>
      %26 = arith.addf %24, %25 : vector<1x128xf32>
      %27 = math.rsqrt %26 : vector<1x128xf32>
      %28 = arith.index_cast %1 : i32 to index
      %c0_12 = arith.constant 0 : index
      %29 = vector.load %arg15[%28, %c0_12] : memref<32x128xf32, #tpu.memory_space<vmem>>, vector<32x128xf32>
      %c0_13 = arith.constant 0 : index
      %c0_14 = arith.constant 0 : index
      %c0_15 = arith.constant 0 : index
      %30 = vector.load %arg9[%c0_13, %c0_14, %c0_15] : memref<1x1x128xf32, #tpu.memory_space<vmem>>, vector<1x1x128xf32>
      %31 = vector.shape_cast %30 : vector<1x1x128xf32> to vector<1x128xf32>
      %32 = vector.broadcast %17 : vector<1x128xf32> to vector<32x128xf32>
      %33 = arith.subf %29, %32 : vector<32x128xf32>
      %34 = vector.broadcast %31 : vector<1x128xf32> to vector<32x128xf32>
      %35 = arith.mulf %34, %33 : vector<32x128xf32>
      %36 = vector.broadcast %27 : vector<1x128xf32> to vector<32x128xf32>
      %37 = arith.mulf %35, %36 : vector<32x128xf32>
      %c0_16 = arith.constant 0 : index
      %c0_17 = arith.constant 0 : index
      %c0_18 = arith.constant 0 : index
      %38 = vector.load %arg10[%c0_16, %c0_17, %c0_18] : memref<1x1x128xf32, #tpu.memory_space<vmem>>, vector<1x1x128xf32>
      %39 = vector.shape_cast %38 : vector<1x1x128xf32> to vector<1x128xf32>
      %40 = vector.broadcast %39 : vector<1x128xf32> to vector<32x128xf32>
      %41 = arith.addf %37, %40 : vector<32x128xf32>
      %c0_19 = arith.constant 0 : index
      %c0_20 = arith.constant 0 : index
      %42 = vector.load %arg12[%c0_19, %c0_20] : memref<32x128xf32, #tpu.memory_space<vmem>>, vector<32x128xf32>
      tpu.vector_store %arg12[%c0_19, %c0_20], %41 {strides = array<i32>} : memref<32x128xf32, #tpu.memory_space<vmem>>, vector<32x128xf32>,
      %43 = arith.truncf %41 : vector<32x128xf32> to vector<32x128xbf16>
      %44 = arith.index_cast %1 : i32 to index
      %c0_21 = arith.constant 0 : index
      %45 = vector.load %arg14[%44, %c0_21] : memref<32x128xbf16, #tpu.memory_space<vmem>>, vector<32x128xbf16>
      tpu.vector_store %arg14[%44, %c0_21], %43 {strides = array<i32>} : memref<32x128xbf16, #tpu.memory_space<vmem>>, vector<32x128xbf16>,
      %c0_i32_22 = arith.constant 0 : i32
      %46 = arith.cmpi eq, %arg2, %c0_i32_22 : i32
      %47 = arith.extui %46 : i1 to i32
      %c0_i32_23 = arith.constant 0 : i32
      %48 = arith.cmpi ne, %47, %c0_i32_23 : i32
      scf.if %48 {
        %cst_31 = arith.constant 0.000000e+00 : f32
        %54 = vector.broadcast %cst_31 : f32 to vector<4x128xf32>
        %c0_32 = arith.constant 0 : index
        %c0_33 = arith.constant 0 : index
        %55 = vector.load %arg13[%c0_32, %c0_33] : memref<4x128xf32, #tpu.memory_space<vmem>>, vector<4x128xf32>
        tpu.vector_store %arg13[%c0_32, %c0_33], %54 {strides = array<i32>} : memref<4x128xf32, #tpu.memory_space<vmem>>, vector<4x128xf32>,
      } else {
      }
      %c0_24 = arith.constant 0 : index
      %c0_25 = arith.constant 0 : index
      %49 = vector.load %arg13[%c0_24, %c0_25] : memref<4x128xf32, #tpu.memory_space<vmem>>, vector<4x128xf32>
      %c0_26 = arith.constant 0 : index
      %c0_27 = arith.constant 0 : index
      %50 = vector.load %arg11[%c0_26, %c0_27] : memref<4x32xf32, #tpu.memory_space<vmem>>, vector<4x32xf32>
      %cst_28 = arith.constant dense<0.000000e+00> : vector<4x128xf32>
      %51 = tpu.matmul %50, %41, %cst_28 {dimension_numbers = #tpu.dot_dimension_numbers<[1], [0], [0], [1], [0, 0, 1, 1], [], []>} : vector<4x32xf32>, vector<32x128xf32>, vector<4x128xf32> -> vector<4x128xf32>
      %52 = arith.addf %49, %51 : vector<4x128xf32>
      %c0_29 = arith.constant 0 : index
      %c0_30 = arith.constant 0 : index
      %53 = vector.load %arg13[%c0_29, %c0_30] : memref<4x128xf32, #tpu.memory_space<vmem>>, vector<4x128xf32>
      tpu.vector_store %arg13[%c0_29, %c0_30], %52 {strides = array<i32>} : memref<4x128xf32, #tpu.memory_space<vmem>>, vector<4x128xf32>,
    } else {
    }
    return
  }
  func.func @transform_0(%arg0: i32, %arg1: i32, %arg2: i32) -> (i32, i32) {
    %c0_i32 = arith.constant 0 : i32
    %c0_i32_0 = arith.constant 0 : i32
    %c0_i32_1 = arith.constant 0 : i32
    return %c0_i32, %c0_i32_0 : i32, i32
  }
  func.func @transform_2(%arg0: i32, %arg1: i32, %arg2: i32) -> (i32, i32, i32) {
    %c0_i32 = arith.constant 0 : i32
    %c0_i32_0 = arith.constant 0 : i32
    %c0_i32_1 = arith.constant 0 : i32
    return %arg0, %c0_i32, %c0_i32_0 : i32, i32, i32
  }
  func.func @transform_3(%arg0: i32, %arg1: i32, %arg2: i32) -> (i32, i32, i32) {
    %c0_i32 = arith.constant 0 : i32
    %c0_i32_0 = arith.constant 0 : i32
    %c0_i32_1 = arith.constant 0 : i32
    return %arg0, %c0_i32, %c0_i32_0 : i32, i32, i32
  }
  func.func @transform_4(%arg0: i32, %arg1: i32, %arg2: i32) -> (i32, i32, i32) {
    %c0_i32 = arith.constant 0 : i32
    %c0_i32_0 = arith.constant 0 : i32
    %c0_i32_1 = arith.constant 0 : i32
    return %arg0, %c0_i32, %c0_i32_0 : i32, i32, i32
  }
  func.func @transform_5(%arg0: i32, %arg1: i32, %arg2: i32) -> (i32, i32, i32) {
    %c0_i32 = arith.constant 0 : i32
    %c0_i32_0 = arith.constant 0 : i32
    %c0_i32_1 = arith.constant 0 : i32
    return %arg0, %c0_i32, %c0_i32_0 : i32, i32, i32
  }
  func.func @transform_6(%arg0: i32, %arg1: i32, %arg2: i32) -> (i32, i32, i32) {
    %c0_i32 = arith.constant 0 : i32
    %c0_i32_0 = arith.constant 0 : i32
    %c0_i32_1 = arith.constant 0 : i32
    return %arg0, %c0_i32, %c0_i32_0 : i32, i32, i32
  }
  func.func @transform_7(%arg0: i32, %arg1: i32, %arg2: i32) -> (i32, i32, i32) {
    %c0_i32 = arith.constant 0 : i32
    %c0_i32_0 = arith.constant 0 : i32
    %c0_i32_1 = arith.constant 0 : i32
    return %arg0, %c0_i32, %c0_i32_0 : i32, i32, i32
  }
  func.func @transform_8(%arg0: i32, %arg1: i32, %arg2: i32) -> (i32, i32) {
    %c1_i32 = arith.constant 1 : i32
    %0 = arith.cmpi eq, %arg1, %c1_i32 : i32
    %c0_i32 = arith.constant 0 : i32
    %1 = arith.select %0, %arg2, %c0_i32 : i32
    %c0_i32_0 = arith.constant 0 : i32
    %c0_i32_1 = arith.constant 0 : i32
    return %c0_i32_0, %1 : i32, i32
  }
  func.func @transform_9(%arg0: i32, %arg1: i32, %arg2: i32) -> (i32, i32) {
    %c1_i32 = arith.constant 1 : i32
    %0 = arith.cmpi eq, %arg1, %c1_i32 : i32
    %c0_i32 = arith.constant 0 : i32
    %1 = arith.select %0, %arg2, %c0_i32 : i32
    %c0_i32_0 = arith.constant 0 : i32
    return %1, %arg0 : i32, i32
  }
  func.func @transform_10(%arg0: i32, %arg1: i32, %arg2: i32) -> (i32, i32) {
    %c0_i32 = arith.constant 0 : i32
    %c0_i32_0 = arith.constant 0 : i32
    return %c0_i32, %arg0 : i32, i32
  }
}

</mosaic_0001>

<bundles_post_ra>
// kernel: _lambda_.1
= control target key start
LH: loop header
LB: loop body
LE: loop exit
PB: predicated region body
PF: predicated region fallthrough
CT: control target
= control target key end

     0   :  { %s1844_s0 = inlined_call_operand.vmem [shape: bf16[32,32], index: 0, kind: input, shape index: {}]   ;;  %s1845_s1 = inlined_call_operand.vmem [shape: bf16[32,128], index: 1, kind: input, shape index: {}]   ;;  %s1846_s2 = inlined_call_operand.vmem [shape: bf16[3,128,128], index: 2, kind: input, shape index: {}]   ;;  %s1847_s3 = inlined_call_operand.vmem [shape: f32[3,1,128], index: 3, kind: input, shape index: {}]   ;;  %s1848_s4 = inlined_call_operand.vmem [shape: bf16[3,128,128], index: 4, kind: input, shape index: {}]   ;;  %s1849_s5 = inlined_call_operand.vmem [shape: f32[3,1,128], index: 5, kind: input, shape index: {}]   ;;  %s1850_s6 = inlined_call_operand.vmem [shape: f32[3,1,128], index: 6, kind: input, shape index: {}]   ;;  %s1851_s7 = inlined_call_operand.vmem [shape: f32[3,1,128], index: 7, kind: input, shape index: {}]   ;;  %s1852_s8 = inlined_call_operand.vmem [shape: f32[4,32], index: 8, kind: input, shape index: {}]   ;;  %s1853_s9 = inlined_call_operand.vmem [shape: f32[32,384], index: 9, kind: output, shape index: {0}]   ;;  %s1854_s10 = inlined_call_operand.vmem [shape: f32[4,384], index: 10, kind: output, shape index: {1}]  }
   0x1   :  { %1861 = sst [smem:[#allocation18_spill]] %s1846_s2 }
   0x2   :  { %1862 = sst [smem:[#allocation19_spill]] %s1853_s9 }
   0x3   :  { %s1658_s13 = smov 0   ;;  %s1660_s14 = smov 0  }
   0x4   :  { %s1662_s15 = smov 0   ;;  %s1664_s16 = smov 0  }
   0x5   :  { %s1666_s17 = smov 0   ;;  %s1668_s18 = smov 0  }
   0x6   :  { %s1670_s19 = smov 0  }
   0x7 LB: > { %1863 = sst [smem:[#allocation10_spill]] %s1577_s14  ;;  %s36_s20 = sadd.s32 1, %s1589_s17  ;;  %s1597_s19 = sphi %s1670_s19, %s21_s19   ;;  %s1593_s18 = sphi %s1668_s18, %s1882_s18   ;;  %s1589_s17 = sphi %s1666_s17, %s1881_s17   ;;  %s1585_s16 = sphi %s1664_s16, %s1880_s16   ;;  %s1581_s15 = sphi %s1662_s15, %s1879_s15   ;;  %s1577_s14 = sphi %s1660_s14, %s1878_s14   ;;  %s1573_s13 = sphi %s1658_s13, %s1877_s13  }
   0x8   : > { %1864 = sst [smem:[#allocation11_spill]] %s1585_s16  ;;  %p38_p0 = scmp.ge.s32.totalorder %s36_s20, 2 }
   0x9   : > { %1865 = sst [smem:[#allocation12_spill]] %s1589_s17  ;;  %s40_s21 = sadd.s32 1, %s1593_s18 }
   0xa   : > { %1866 = sst [smem:[#allocation13_spill]] %s1593_s18  ;;  %s1320_s22 = sadd.s32 4294967295, %s1597_s19  }
   0xb   : > { %1867 = sst [smem:[#allocation14_spill]] %s1597_s19  ;;  %p270_p1 = scmp.ne.s32.totalorder %s1577_s14, %s1573_s13 }
   0xc   : > { %s1884_s20 = smov (%p38_p0, %s36_s20), 0  ;;  %s1886_s21 = smov (!%p38_p0, %s40_s21), %s1593_s18 }
   0xd   : > { %1868 = sst [smem:[#allocation15_spill]] %s1884_s20  ;;  %p271_p2 = scmp.eq.s32.totalorder %s1320_s22, 5 }
   0xe   : > { %p1325_p3 = scmp.ge.s32.totalorder %s1597_s19, 1  ;;  %p42_p4 = scmp.ge.s32.totalorder %s1886_s21, 3 }
   0xf   : > { %p375_p5 = scmp.lt.s32.totalorder %s1597_s19, 7  ;;  %p1700_p6 = por %p271_p2, %p270_p1 }
  0x10   : > { %s1888_s21 = smov (%p42_p4, %s1886_s21), 0  ;;  %s260_s25 = sadd.s32 1, %s1577_s14 }
  0x11   : > { %1870 = sst [smem:[#allocation16_spill]] %s1888_s21  ;;  %p376_p7 = pnand %p1325_p3, %p375_p5 }
  0x12   : > { %s256_s24 = ssub.s32 %s1593_s18, %s1888_s21  ;;  %s428_s27 = sand.u32 (!%p376_p7), 1, %s1573_s13  }
  0x13   : > { %p258_p8 = scmp.eq.s32.totalorder %s256_s24, 0  ;;  %379 = sbr.rel (%p376_p7) target bundleno = 995 (0x3e3), region = 52 }
  0x14   : > { %p437_p9 = scmp.lt.s32.totalorder (!%p376_p7), %s1585_s16, 2  ;;  %s1326_s28 = sshll.u32 (!%p376_p7), %s428_s27, 5 }
  0x15   : > { %s1710_s26 = scalar_select %p258_p8, %s1577_s14, %s260_s25  }
  0x16   : > { %p476_p10 = scmp.eq.s32.totalorder (!%p376_p7), %s1585_s16, 0  ;;  %p477_p11 = scmp.eq.s32.totalorder (!%p376_p7), %s1581_s15, 0 }
  0x17   : > { %1871 = sst [smem:[#allocation17_spill]] %s1710_s26  ;;  %s1751_s21 = scalar_lea.vmem (!%p376_p7), [#allocation7], %s1326_s28 }
  0x18   : > { %p478_p12 = pnand (!%p376_p7), %p477_p11, %p476_p10  ;;  %s1872_s2 = sld [smem:[#allocation18_spill]] (!%p376_p7) }
  0x1a   : > { %s1716_s29 = scalar_select %p437_p9, %s1585_s16, 2 }
  0x1b   : > { %484 = sbr.rel (%p478_p12) target bundleno = 37 (0x25), region = 56  ;;  %v517_v0 = vld [vmem:[%s1845_s1] sm:$0xff] (!%p478_p12)  ;;  %v519_v1 = vld [vmem:[%s1845_s1 + $0x8] sm:$0xff] (!%p478_p12) }
  0x1c   : > { %s1365_s30 = sshll.u32 %s1716_s29, 6  ;;  %s452_s26 = scalar_lea.vmem %s1849_s5, %s1716_s29  ;;  %518 = vst [vmem:[#allocation2] sm:$0xff] (!%p478_p12), %v517_v0  ;;  %520 = vst [vmem:[#allocation2 + $0x8] sm:$0xff] (!%p478_p12), %v519_v1 }
  0x1d   : > { %s1731_s20 = scalar_lea.vmem %s1848_s4, %s1365_s30  ;;  %s455_s9 = scalar_lea.vmem %s1850_s6, %s1716_s29 }
  0x1e   : > { %s1726_s25 = scalar_lea.vmem %s1872_s2, %s1365_s30  ;;  %s458_s13 = scalar_lea.vmem %s1851_s7, %s1716_s29 }
  0x1f   : > { %s1331_s22 = sshll.u32 %s1716_s29, 2 }
  0x20   : > { %s1749_s16 = scalar_lea.vmem %s1854_s10, %s1331_s22 }
  0x22   : > { %528 = vsyncadd [#allocation6], 256 }
  0x23   : > { %1569 = dma.done.wait [#allocation6], 256 }
  0x24   : > { %1570 = vsyncadd [#allocation6], 4294967040 }
  0x25 PF: > { %p1333_p13 = scmp.ne.s32.totalorder %s1581_s15, 0 }
  0x26   : > { %v549_v2 = vld [vmem:[#allocation2] sm:$0xff] (!%p1333_p13)  ;;  %v550_v3 = vld [vmem:[#allocation2 + $0x8] sm:$0xff] (!%p1333_p13)  ;;  %vm561_vm0 = vcmask (!%p1333_p13), 261120   ;;  %v1525_v8 = vld [vmem:[%s1726_s25 + $0x10] sm:$0xff] (!%p1333_p13)   ;;  %s1873_s12 = scalar_lea.vmem (!%p1333_p13), %s1847_s3, %s1716_s29  ;;  %v1599_v43 = vmov (!%p1333_p13), 0.0  }
  0x27   : > { %535 = sbr.rel (%p1333_p13) target bundleno = 729 (0x2d9), region = 94  ;;  %1396 = vmatprep.subr.bf16.mxu0 (!%p1333_p13), %v549_v2  ;;  %v1521_v4 = vld [vmem:[%s1844_s0] sm:$0xff] (!%p1333_p13)   ;;  %v1524_v6 = vld [vmem:[%s1726_s25 + $0x8] sm:$0xff] (!%p1333_p13)   ;;  %v1526_v9 = vld [vmem:[%s1726_s25 + $0x18] sm:$0xff] (!%p1333_p13)   ;;  %539 = vst [vmem:[#allocation4] sm:$0x1] (!%p1333_p13), %v1599_v43 }
  0x28   : > { %1397 = vmatpush3.bf16.msra.mxu0 (!%p1333_p13), %v549_v2  ;;  %1400 = vmatprep.mubr.msk.bf16.mxu0 (!%p1333_p13), %vm561_vm0, %v1521_v4  ;;  %v1523_v5 = vld [vmem:[%s1726_s25] sm:$0xff] (!%p1333_p13)   ;;  %v1522_v7 = vld [vmem:[%s1844_s0 + $0x8] sm:$0xff] (!%p1333_p13)   ;;  %v1529_v12 = vld [vmem:[%s1726_s25 + $0x30] sm:$0xff] (!%p1333_p13)   ;;  %540 = vst [vmem:[#allocation5] sm:$0x1] (!%p1333_p13), %v1599_v43 }
  0x29   : > { %1398 = vmatprep.subr.bf16.mxu0 (!%p1333_p13), %v550_v3  ;;  %1404 = vmatprep.subr.bf16.mxu1 (!%p1333_p13), %v1523_v5  ;;  %v1527_v10 = vld [vmem:[%s1726_s25 + $0x20] sm:$0xff] (!%p1333_p13)   ;;  %v1528_v11 = vld [vmem:[%s1726_s25 + $0x28] sm:$0xff] (!%p1333_p13)   ;;  %v1530_v13 = vld [vmem:[%s1726_s25 + $0x38] sm:$0xff] (!%p1333_p13)  }
  0x2a   : > { %1405 = vmatpush3.bf16.msra.mxu1 (!%p1333_p13), %v1523_v5  ;;  %v1531_v14 = vld [vmem:[%s1731_s20] sm:$0xff] (!%p1333_p13)   ;;  %v1532_v15 = vld [vmem:[%s1731_s20 + $0x8] sm:$0xff] (!%p1333_p13)   ;;  %v1533_v16 = vld [vmem:[%s1731_s20 + $0x10] sm:$0xff] (!%p1333_p13)  }
  0x2b   : > { %1406 = vmatprep.subr.bf16.mxu1 (!%p1333_p13), %v1524_v6  ;;  %v1534_v17 = vld [vmem:[%s1731_s20 + $0x18] sm:$0xff] (!%p1333_p13)   ;;  %v1535_v18 = vld [vmem:[%s1731_s20 + $0x20] sm:$0xff] (!%p1333_p13)   ;;  %v1536_v19 = vld [vmem:[%s1731_s20 + $0x28] sm:$0xff] (!%p1333_p13)  }
  0x2c   : > { %1399 = vmatpush3.bf16.msra.mxu0 (!%p1333_p13), %v550_v3  ;;  %v1537_v26 = vld [vmem:[%s1731_s20 + $0x30] sm:$0xff] (!%p1333_p13)   ;;  %v1538_v27 = vld [vmem:[%s1731_s20 + $0x38] sm:$0xff] (!%p1333_p13)   ;;  %v1338_v28 = vld [vmem:[%s1873_s12] ss:$0 sm:$0xff] (!%p1333_p13) }
  0x2d   : > { %1424 = vmatprep.subr.bf16.mxu0 (!%p1333_p13), %v1531_v14  ;;  %v1347_v44 = vld [vmem:[%s452_s26] ss:$0 sm:$0xff] (!%p1333_p13) }
  0x2e   : > { %1407 = vmatpush3.bf16.msra.mxu1 %v1524_v6 }
  0x2f   : > { %1401 = vmatmul.mubr.msk.bf16.vlgmr.msra.gmra.mrb[0].mxu0 %vm561_vm0, %v1522_v7  ;;  %1408 = vmatprep.subr.bf16.mxu1 %v1525_v8 }
  0x30   : > { %1425 = vmatpush3.bf16.msra.mxu0 %v1531_v14 }
  0x31   : > { %1426 = vmatprep.subr.bf16.mxu0 %v1532_v15 }
  0x32   : > { %1409 = vmatpush3.bf16.msra.mxu1 %v1525_v8 }
  0x33   : > { %1410 = vmatprep.subr.bf16.mxu1 %v1526_v9 }
  0x34   : > { %1427 = vmatpush3.bf16.msra.mxu0 %v1532_v15  ;;  %v912_v15 = vld [vmem:[#allocation5] sm:$0x1] }
  0x35   : > { %1428 = vmatprep.subr.bf16.mxu0 %v1533_v16 }
  0x36   : > { %1411 = vmatpush3.bf16.msra.mxu1 %v1526_v9 }
  0x37   : > { %1412 = vmatprep.subr.bf16.mxu1 %v1527_v10 }
  0x38   : > { %1429 = vmatpush3.bf16.msra.mxu0 %v1533_v16 }
  0x39   : > { %1430 = vmatprep.subr.bf16.mxu0 %v1534_v17 }
  0x3a   : > { %1413 = vmatpush3.bf16.msra.mxu1 %v1527_v10 }
  0x3b   : > { %1414 = vmatprep.subr.bf16.mxu1 %v1528_v11 }
  0x3c   : > { %1431 = vmatpush3.bf16.msra.mxu0 %v1534_v17 }
  0x3d   : > { %1432 = vmatprep.subr.bf16.mxu0 %v1535_v18 }
  0x3e   : > { %1415 = vmatpush3.bf16.msra.mxu1 %v1528_v11 }
  0x3f   : > { %1416 = vmatprep.subr.bf16.mxu1 %v1529_v12 }
  0x40   : > { %1433 = vmatpush3.bf16.msra.mxu0 %v1535_v18 }
  0x41   : > { %1434 = vmatprep.subr.bf16.mxu0 %v1536_v19 }
  0x42   : > { %1417 = vmatpush3.bf16.msra.mxu1 %v1529_v12  ;;  %v900_v12 = vld [vmem:[#allocation4] sm:$0x1] }
  0x43   : > { %1418 = vmatprep.subr.bf16.mxu1 %v1530_v13 }
  0x44   : > { %1435 = vmatpush3.bf16.msra.mxu0 %v1536_v19 }
  0x45   : > { %1436 = vmatprep.subr.bf16.mxu0 %v1537_v26 }
  0x46   : > { %1419 = vmatpush3.bf16.msra.mxu1 %v1530_v13 }
  0x48   : > { %1437 = vmatpush3.bf16.msra.mxu0 %v1537_v26 }
  0x49   : > { %1438 = vmatprep.subr.bf16.mxu0 %v1538_v27 }
  0x4c   : > { %1439 = vmatpush3.bf16.msra.mxu0 %v1538_v27 }
 0x102   : > { %v1402_v20 = vpop.f32.mrb[0].mxu0 }
 0x103   : > { %v602_v21 = vpop.f32.mrb[1].mxu0 }
 0x104   : > { %v1403_v22 = vpop.f32.mrb[2].mxu0 }
 0x105   : > { %v618_v23 = vpack.c.bf16 %v1403_v22, %v1402_v20  ;;  %v605_v24 = vpop.f32.mrb[3].mxu0 }
 0x106   : > { %v617_v25 = vpack.c.bf16 %v605_v24, %v602_v21 }
 0x108   : > { %1420 = vmatprep.mubr.bf16.mxu1 %v617_v25 }
 0x109   : > { %1421 = vmatmul.mubr.bf16.vlgmr.msra.gmra.mrb[0].mxu1 %v618_v23 }
 0x1dc   : > { %v1422_v29 = vpop.f32.mrb[0].mxu1 }
 0x1dd   : > { %v733_v30 = vadd.f32 %v1422_v29, %v1338_v28  ;;  %v724_v31 = vpop.f32.mrb[1].mxu1 }
 0x1de   : > { %v725_v32 = vadd.f32 %v1338_v28, %v724_v31  ;;  %v1423_v33 = vpop.f32.mrb[2].mxu1 }
 0x1df   : > { %v736_v34 = vadd.f32 %v1423_v33, %v1338_v28  ;;  %v727_v35 = vpop.f32.mrb[3].mxu1  ;;  %v741_v37 = vmax.f32 %v733_v30, 0.0 }
 0x1e0   : > { %v728_v36 = vadd.f32 %v1338_v28, %v727_v35  ;;  %v739_v39 = vmax.f32 %v725_v32, 0.0 }
 0x1e1   : > { %v742_v38 = vmax.f32 %v736_v34, 0.0 }
 0x1e2   : > { %v740_v40 = vmax.f32 %v728_v36, 0.0 }
 0x1e3   : > { %v744_v41 = vpack.c.bf16 %v742_v38, %v741_v37 }
 0x1e4   : > { %v743_v42 = vpack.c.bf16 %v740_v40, %v739_v39 }
 0x1e6   : > { %1440 = vmatprep.mubr.bf16.mxu0 %v743_v42 }
 0x1e7   : > { %1441 = vmatmul.mubr.bf16.vlgmr.msra.gmra.mrb[4].mxu0 %v744_v41 }
 0x2ba   : > { %v1442_v45 = vpop.f32.mrb[4].mxu0 }
 0x2bb   : > { %v859_v46 = vadd.f32 %v1442_v45, %v1347_v44  ;;  %v850_v47 = vpop.f32.mrb[5].mxu0 }
 0x2bc   : > { %v851_v48 = vadd.f32 %v1347_v44, %v850_v47  ;;  %v1443_v49 = vpop.f32.mrb[6].mxu0 }
 0x2bd   : > { %v867_v50 = vmax.f32 %v859_v46, 0.0  ;;  %v862_v51 = vadd.f32 %v1443_v49, %v1347_v44  ;;  %v853_v52 = vpop.f32.mrb[7].mxu0 }
 0x2be   : > { %v865_v53 = vmax.f32 %v851_v48, 0.0  ;;  %v854_v54 = vadd.f32 %v1347_v44, %v853_v52 }
 0x2bf   : > { %898 = vst [vmem:[#allocation3 + $0x10] sm:$0xff] %v867_v50  ;;  %v868_v55 = vmax.f32 %v862_v51, 0.0  ;;  %v915_v60 = vmul.f32 %v867_v50, %v867_v50 }
 0x2c0   : > { %896 = vst [vmem:[#allocation3] sm:$0xff] %v865_v53  ;;  %v866_v56 = vmax.f32 %v854_v54, 0.0  ;;  %v913_v57 = vmul.f32 %v865_v53, %v865_v53 }
 0x2c1   : > { %899 = vst [vmem:[#allocation3 + $0x18] sm:$0xff] %v868_v55  ;;  %v916_v63 = vmul.f32 %v868_v55, %v868_v55 }
 0x2c2   : > { %897 = vst [vmem:[#allocation3 + $0x8] sm:$0xff] %v866_v56  ;;  %v901_v58 = vadd.f32 %v866_v56, %v865_v53  ;;  %v914_v59 = vmul.f32 %v866_v56, %v866_v56 }
 0x2c4   : > { %v902_v61 = vadd.f32 %v901_v58, %v867_v50  ;;  %v917_v62 = vadd.f32 %v914_v59, %v913_v57 }
 0x2c6   : > { %v903_v0 = vadd.f32 %v902_v61, %v868_v55  ;;  %v918_v1 = vadd.f32 %v917_v62, %v915_v60 }
 0x2c8   : > { %v904_v2 = vrot.slane %v903_v0, 4  ;;  %v919_v3 = vadd.f32 %v918_v1, %v916_v63 }
 0x2ca   : > { %v905_v4 = vadd.f32 %v904_v2, %v903_v0  ;;  %v920_v5 = vrot.slane %v919_v3, 4 }
 0x2cc   : > { %v906_v6 = vrot.slane %v905_v4, 2  ;;  %v921_v7 = vadd.f32 %v920_v5, %v919_v3 }
 0x2ce   : > { %v907_v8 = vadd.f32 %v906_v6, %v905_v4  ;;  %v922_v9 = vrot.slane %v921_v7, 2 }
 0x2d0   : > { %v908_v10 = vrot.slane %v907_v8, 1  ;;  %v923_v11 = vadd.f32 %v922_v9, %v921_v7 }
 0x2d2   : > { %v909_v13 = vadd.f32 %v908_v10, %v907_v8  ;;  %v924_v14 = vrot.slane %v923_v11, 1 }
 0x2d4   : > { %v910_v16 = vadd.f32 %v909_v13, %v900_v12  ;;  %v925_v17 = vadd.f32 %v924_v14, %v923_v11 }
 0x2d6   : > { %911 = vst [vmem:[#allocation4] sm:$0x1] %v910_v16  ;;  %v926_v18 = vadd.f32 %v925_v17, %v912_v15 }
 0x2d8   : > { %927 = vst [vmem:[#allocation5] sm:$0x1] %v926_v18 }
 0x2d9 PF: > { %p1356_p0 = scmp.ne.s32.totalorder %s1581_s15, 1 }
 0x2da   : > { %v948_v21 = vlaneseq (!%p1356_p0)  ;;  %v1600_v22 = vmov (!%p1356_p0), 0.0|0.0   ;;  %v1601_v26 = vmov (!%p1356_p0), 0.0   ;;  %vm1602_vm1 = vmmov (!%p1356_p0), 0   ;;  %v942_v32 = vld [vmem:[#allocation3] sm:$0xff] (!%p1356_p0)  ;;  %v943_v34 = vld [vmem:[#allocation3 + $0x8] sm:$0xff] (!%p1356_p0)  ;;  %v944_v35 = vld [vmem:[#allocation3 + $0x10] sm:$0xff] (!%p1356_p0) }
 0x2db   : > { %931 = sbr.rel (%p1356_p0) target bundleno = 985 (0x3d9), region = 102  ;;  %1455 = vmatprep.subr.bf16.mxu0 (!%p1356_p0), %v1600_v22  ;;  %1003 = vst [vmem:[%s1749_s16] sm:$0xf] (!%p1356_p0), %v1601_v26  ;;  %1452 = vmatprep.mubr.msk.f32.mxu0 (!%p1356_p0), %vm1602_vm1, %v1601_v26  ;;  %v945_v36 = vld [vmem:[#allocation3 + $0x18] sm:$0xff] (!%p1356_p0)  ;;  %v1357_v41 = vld [vmem:[%s455_s9] ss:$0 sm:$0xff] (!%p1356_p0)  ;;  %vm1006_vm2 = vcmask (!%p1356_p0), 261120  }
 0x2dc   : > { %v949_v27 = vshrl.u32 (!%p1356_p0), %v948_v21, 7  ;;  %v1358_v48 = vld [vmem:[%s458_s13] ss:$0 sm:$0xff] (!%p1356_p0) }
 0x2dd   : > { %v932_v19 = vld [vmem:[#allocation4] sm:$0x1] (!%p1356_p0)  ;;  %v1005_v59 = vld [vmem:[%s1852_s8] sm:$0xf] (!%p1356_p0) }
 0x2de   : > { %v933_v23 = vmul.f32 (!%p1356_p0), 0.03125, %v932_v19  ;;  %v950_v30 = vsub.s32 (!%p1356_p0), 0, %v949_v27 }
 0x2df   : > { %v934_v20 = vld [vmem:[#allocation5] sm:$0x1] (!%p1356_p0) }
 0x2e0   : > { %v935_v24 = vmul.f32 (!%p1356_p0), 0.03125, %v934_v20  ;;  %v936_v25 = vmul.f32 (!%p1356_p0), %v933_v23, %v933_v23  ;;  %v951_v33 = vrot.slane (!%p1356_p0), %v933_v23, %v950_v30 }
 0x2e2   : > { %v937_v28 = vsub.f32 %v935_v24, %v936_v25  ;;  %v953_v37 = vsub.f32 %v942_v32, %v951_v33  ;;  %v954_v38 = vsub.f32 %v943_v34, %v951_v33  ;;  %v955_v39 = vsub.f32 %v944_v35, %v951_v33  ;;  %v1004_v60 = vld [vmem:[%s1749_s16] sm:$0xf] }
 0x2e3   : > { %v956_v40 = vsub.f32 %v945_v36, %v951_v33 }
 0x2e4   : > { %v938_v29 = vmax.f32 %v937_v28, 0.0  ;;  %v963_v42 = vmul.f32 %v1357_v41, %v953_v37  ;;  %v964_v43 = vmul.f32 %v1357_v41, %v954_v38  ;;  %v965_v44 = vmul.f32 %v1357_v41, %v955_v39 }
 0x2e5   : > { %v966_v45 = vmul.f32 %v1357_v41, %v956_v40 }
 0x2e6   : > { %v939_v31 = vadd.f32 1e-05, %v938_v29 }
 0x2e8   : > { %1539 = vrsqrt.f32 %v939_v31 }
 0x2f2   : > { %v1540_v46 = vpop.eup %1539 }
 0x2f3   : > { %v971_v47 = vrot.slane %v1540_v46, %v950_v30 }
 0x2f5   : > { %v973_v49 = vmul.f32 %v971_v47, %v963_v42  ;;  %v974_v50 = vmul.f32 %v971_v47, %v964_v43  ;;  %v975_v51 = vmul.f32 %v971_v47, %v965_v44  ;;  %v976_v52 = vmul.f32 %v971_v47, %v966_v45 }
 0x2f7   : > { %v984_v53 = vadd.f32 %v1358_v48, %v973_v49  ;;  %v985_v54 = vadd.f32 %v1358_v48, %v974_v50  ;;  %v986_v55 = vadd.f32 %v1358_v48, %v975_v51  ;;  %v987_v56 = vadd.f32 %v1358_v48, %v976_v52 }
 0x2f9   : > { %988 = vst [vmem:[%s1751_s21] sm:$0xff] %v984_v53  ;;  %989 = vst [vmem:[%s1751_s21 + $0x8] sm:$0xff] %v985_v54  ;;  %v992_v57 = vpack.c.bf16 %v985_v54, %v984_v53  ;;  %v993_v58 = vpack.c.bf16 %v987_v56, %v986_v55 }
 0x2fa   : > { %990 = vst [vmem:[%s1751_s21 + $0x10] sm:$0xff] %v986_v55  ;;  %991 = vst [vmem:[%s1751_s21 + $0x18] sm:$0xff] %v987_v56 }
 0x2fb   : > { %998 = vst [vmem:[#allocation2] sm:$0xff] %v992_v57  ;;  %1457 = vmatpush3.bf16.msra.mxu0 %v992_v57  ;;  %999 = vst [vmem:[#allocation2 + $0x8] sm:$0xff] %v993_v58 }
 0x2fc   : > { %1458 = vmatprep.subr.bf16.mxu0 %v1600_v22 }
 0x2ff   : > { %1460 = vmatpush3.bf16.msra.mxu0 %v993_v58 }
 0x302   : > { %1453 = vmatmul.mubr.msk.f32.vlgmr.msra.gmra.mrb[0].mxu0 %vm1006_vm2, %v1005_v59 }
 0x3d5   : > { %v1076_v61 = vpop.f32.mrb[0].mxu0 }
 0x3d6   : > { %v1080_v62 = vadd.f32 %v1076_v61, %v1004_v60  ;;  %v1454_v63 = vpop.f32.mrb[1].mxu0 }
 0x3d8   : > { %1081 = vst [vmem:[%s1749_s16] sm:$0xf] %v1080_v62 }
 0x3d9 PF: > { %1092 = sbr.rel (!%p1700_p6) target bundleno = 995 (0x3e3), region = 110  ;;  %s1874_s13 = sld [smem:[#allocation11_spill]] (%p1700_p6)  ;;  %v1133_v0 = vld [vmem:[%s1751_s21] sm:$0xff] (%p1700_p6)  ;;  %v1135_v1 = vld [vmem:[%s1751_s21 + $0x8] sm:$0xff] (%p1700_p6)  ;;  %v1137_v2 = vld [vmem:[%s1751_s21 + $0x10] sm:$0xff] (%p1700_p6) }
 0x3da   : > { %s1875_s2 = sld [smem:[#allocation19_spill]] (%p1700_p6)  ;;  %v1139_v3 = vld [vmem:[%s1751_s21 + $0x18] sm:$0xff] (%p1700_p6) }
 0x3df   : > { %s1361_s17 = sshll.u32 (%p1700_p6), %s1874_s13, 3 }
 0x3e0   : > { %s1099_s19 = scalar_lea.vmem %s1875_s2, %s1361_s17 }
 0x3e1   : > { %1134 = vst [vmem:[%s1099_s19] sm:$0xff] %v1133_v0  ;;  %1136 = vst [vmem:[%s1099_s19 + $0x18] sm:$0xff] %v1135_v1 }
 0x3e2   : > { %1138 = vst [vmem:[%s1099_s19 + $0x30] sm:$0xff] %v1137_v2  ;;  %1140 = vst [vmem:[%s1099_s19 + $0x48] sm:$0xff] %v1139_v3 }
 0x3e3 PF: > { %s1876_s16 = sld [smem:[#allocation14_spill]]  ;;  %s1877_s13 = sld [smem:[#allocation10_spill]] }
 0x3e4   : > { %s1878_s14 = sld [smem:[#allocation17_spill]]  ;;  %s1879_s15 = sld [smem:[#allocation12_spill]] }
 0x3e5   : > { %s1881_s17 = sld [smem:[#allocation15_spill]]  ;;  %s1882_s18 = sld [smem:[#allocation16_spill]] }
 0x3e9   : > { %s21_s19 = sadd.s32 1, %s1876_s16   ;;  %s1880_s16 = sld [smem:[#allocation13_spill]] }
 0x3ea   : > { %p18_p1 = scmp.ge.s32.totalorder %s21_s19, 8  }
 0x3ec   :  { %20 = sbr.rel (!%p18_p1) target bundleno = 7 (0x7), region = 216 }
 0x3f3   :  { %1166 = vsyncmov [#allocation6] }
 0x3f6   :  { %s1167_s23 = vpop.sfrf %1166 }
 0x3f7   :  { %p1364_p2 = scmp.ne.s32.totalorder %s1167_s23, 0 }
 0x3f9   :  { %1171 = shalt.err (%p1364_p2)  }

</bundles_post_ra>
